<compile_context>
chip_gen: v6e
topology: v6e:2x2x1
jax: 0.10.0
libtpu: 0.0.40
codegen_flags: <defaults>
</compile_context>

<pallas_src>
import functools

import jax
import jax.numpy as jnp
from jax.experimental import pallas as pl
from jax.experimental.pallas import tpu as pltpu


def _smooth_ce_kernel(pred_ref, tgt_ref, out_ref, *,
                      s_by_c, n_valid, tile_n, num_classes,
                      targets_are_labels):
    i = pl.program_id(0)

    p = pred_ref[...].astype(jnp.float32)              # (tile_n, C)

    # log-softmax over the class dim (dim=1)
    m = jnp.max(p, axis=1, keepdims=True)
    z = p - m
    lse = jnp.log(jnp.sum(jnp.exp(z), axis=1, keepdims=True))
    logp = z - lse                                      # (tile_n, C)

    if targets_are_labels:
        lbl = tgt_ref[...]                              # (tile_n, 1) int32
        col = jax.lax.broadcasted_iota(jnp.int32, (tile_n, num_classes), 1)
        t = (col == lbl).astype(jnp.float32)            # one-hot in-register
    else:
        t = tgt_ref[...].astype(jnp.float32)            # (tile_n, C) soft target

    # label smoothing: target * (1 - s/C) + s/C  (static no-op when s_by_c == 0)
    if s_by_c > 0.0:
        t = t * (1.0 - s_by_c) + s_by_c

    row_loss = jnp.sum(-t * logp, axis=1, keepdims=True)   # (tile_n, 1)

    # mask rows beyond the real batch size (ragged last block)
    row_ids = i * tile_n + jax.lax.broadcasted_iota(jnp.int32, (tile_n, 1), 0)
    row_loss = jnp.where(row_ids < n_valid, row_loss, 0.0)

    out_ref[0, 0] = jnp.sum(row_loss)                    # per-block partial sum


def smooth_cross_entropy_loss(pred, target, *, label_smoothing=0.0,
                              size_average=True, max_tile_n=1024,
                              input_vmem_budget=16 * 1024 * 1024):
    """pred: (N, C) float logits (f32 or bf16).
       target: (N,) int labels  or  (N, C) float soft targets.
       Returns a scalar f32 loss (mean over batch if size_average else sum)."""
    N, C = pred.shape
    targets_are_labels = (target.ndim == 1)

    if targets_are_labels:
        tgt = target.astype(jnp.int32).reshape(N, 1)     # tiny side input, no one-hot
        dense_itemsizes = [jnp.dtype(pred.dtype).itemsize]
    else:
        tgt = target                                     # stream in native dtype
        dense_itemsizes = [jnp.dtype(pred.dtype).itemsize,
                           jnp.dtype(target.dtype).itemsize]

    # sublane granularity: f32 -> 8 rows, bf16 -> 16 rows
    min_item = min(dense_itemsizes)
    sub = 8 * (4 // min_item)

    # tile_n from VMEM budget: double-buffered dense inputs must fit the budget
    per_row_bytes = 2 * C * sum(dense_itemsizes)
    cap = input_vmem_budget // per_row_bytes
    cap = (cap // sub) * sub
    cap = max(sub, min(cap, max_tile_n))
    tile_n = N if N <= cap else cap
    num_blocks = pl.cdiv(N, tile_n)

    s_by_c = float(label_smoothing) / float(C) if label_smoothing > 0.0 else 0.0

    kernel = functools.partial(
        _smooth_ce_kernel,
        s_by_c=s_by_c, n_valid=N, tile_n=tile_n, num_classes=C,
        targets_are_labels=targets_are_labels)

    if targets_are_labels:
        tgt_spec = pl.BlockSpec((tile_n, 1), lambda i: (i, 0))
    else:
        tgt_spec = pl.BlockSpec((tile_n, C), lambda i: (i, 0))

    partials = pl.pallas_call(
        kernel,
        out_shape=jax.ShapeDtypeStruct((num_blocks, 1), jnp.float32),
        grid_spec=pltpu.PrefetchScalarGridSpec(
            num_scalar_prefetch=0,
            grid=(num_blocks,),
            in_specs=[
                pl.BlockSpec((tile_n, C), lambda i: (i, 0)),
                tgt_spec,
            ],
            out_specs=pl.BlockSpec((1, 1), lambda i: (i, 0),
                                   memory_space=pltpu.SMEM),
        ),
        compiler_params=pltpu.CompilerParams(
            dimension_semantics=("parallel",),
            vmem_limit_bytes=48 * 1024 * 1024),
    )(pred, tgt)

    total = jnp.sum(partials)
    return total / N if size_average else total


def _reference(pred, target, label_smoothing=0.0, size_average=True):
    N, C = pred.shape
    if target.ndim == 1:
        target = jax.nn.one_hot(target, C, dtype=jnp.float32)
    target = target.astype(jnp.float32)
    if label_smoothing > 0.0:
        s_by_c = label_smoothing / C
        target = target * (1.0 - s_by_c) + s_by_c
    logp = jax.nn.log_softmax(pred.astype(jnp.float32), axis=1)
    per_row = jnp.sum(-target * logp, axis=1)
    return jnp.mean(per_row) if size_average else jnp.sum(per_row)


if __name__ == "__main__":
    key = jax.random.PRNGKey(0)
    k1, k2, k3, k4, k5 = jax.random.split(key, 5)

    # case 1: integer labels + label smoothing, size_average=True (mean)
    N, C = 8, 32
    pred = jax.random.normal(k1, (N, C), dtype=jnp.float32) * 2.0
    labels = jax.random.randint(k2, (N,), 0, C)
    loss1 = smooth_cross_entropy_loss(pred, labels,
                                      label_smoothing=0.1, size_average=True)
    jax.block_until_ready(loss1)
    ref1 = _reference(pred, labels, label_smoothing=0.1, size_average=True)
    assert jnp.allclose(loss1, ref1, rtol=1e-5, atol=1e-5), (loss1, ref1)

    # case 2: soft targets, no smoothing, size_average=False (sum)
    soft = jax.nn.softmax(jax.random.normal(k3, (N, C), dtype=jnp.float32),
                          axis=1)
    loss2 = smooth_cross_entropy_loss(pred, soft,
                                      label_smoothing=0.0, size_average=False)
    jax.block_until_ready(loss2)
    ref2 = _reference(pred, soft, label_smoothing=0.0, size_average=False)
    assert jnp.allclose(loss2, ref2, rtol=1e-5, atol=1e-5), (loss2, ref2)

    # case 3: ragged batch, forced small tile -> multi-block grid + in-kernel mask
    N3, C3 = 37, 160
    pred3 = jax.random.normal(k4, (N3, C3), dtype=jnp.float32)
    labels3 = jax.random.randint(k5, (N3,), 0, C3)
    loss3 = smooth_cross_entropy_loss(pred3, labels3, label_smoothing=0.05,
                                      size_average=True, max_tile_n=16)
    jax.block_until_ready(loss3)
    ref3 = _reference(pred3, labels3, label_smoothing=0.05, size_average=True)
    assert jnp.allclose(loss3, ref3, rtol=1e-5, atol=1e-5), (loss3, ref3)

    # case 4: bf16 logits streamed without any wrapper-side upcast
    pred4 = jax.random.normal(k1, (16, 128), dtype=jnp.float32).astype(jnp.bfloat16)
    labels4 = jax.random.randint(k2, (16,), 0, 128)
    loss4 = smooth_cross_entropy_loss(pred4, labels4,
                                      label_smoothing=0.1, size_average=True)
    jax.block_until_ready(loss4)
    ref4 = _reference(pred4, labels4, label_smoothing=0.1, size_average=True)
    assert jnp.allclose(loss4, ref4, rtol=1e-5, atol=1e-4), (loss4, ref4)

    print("KERNEL_OK")
</pallas_src>

<mosaic_0001>
module attributes {stable_mosaic.version = 11 : i64} {
  func.func @_smooth_ce_kernel(%arg0: i32, %arg1: memref<8x32xf32, #tpu.memory_space<vmem>>, %arg2: memref<8x1xi32, #tpu.memory_space<vmem>>, %arg3: memref<1x1xf32, #tpu.memory_space<smem>>) attributes {dimension_semantics = [#tpu.dimension_semantics<parallel>], iteration_bounds = array<i64: 1>, scalar_prefetch = 0 : i64, scratch_operands = 0 : i64, tpu.core_type = #tpu.core_type<tc>, window_params = [{transform_indices = @transform_0, window_bounds = array<i64: 8, 32>}, {transform_indices = @transform_1, window_bounds = array<i64: 8, 1>}, {transform_indices = @transform_2, window_bounds = array<i64: 1, 1>}]} {
    %c0 = arith.constant 0 : index
    %c0_0 = arith.constant 0 : index
    %0 = vector.load %arg1[%c0, %c0_0] : memref<8x32xf32, #tpu.memory_space<vmem>>, vector<8x32xf32>
    %cst = arith.constant dense<0xFF800000> : vector<8xf32>
    %1 = vector.multi_reduction <maximumf>, %0, %cst [1] : vector<8x32xf32> to vector<8xf32>
    %2 = vector.shape_cast %1 : vector<8xf32> to vector<8x1xf32>
    %3 = vector.broadcast %2 : vector<8x1xf32> to vector<8x32xf32>
    %4 = arith.subf %0, %3 : vector<8x32xf32>
    %5 = math.exp %4 : vector<8x32xf32>
    %cst_1 = arith.constant dense<0.000000e+00> : vector<8xf32>
    %6 = vector.multi_reduction <add>, %5, %cst_1 [1] : vector<8x32xf32> to vector<8xf32>
    %7 = vector.shape_cast %6 : vector<8xf32> to vector<8x1xf32>
    %8 = math.log %7 : vector<8x1xf32>
    %9 = vector.broadcast %8 : vector<8x1xf32> to vector<8x32xf32>
    %10 = arith.subf %4, %9 : vector<8x32xf32>
    %c0_2 = arith.constant 0 : index
    %c0_3 = arith.constant 0 : index
    %11 = vector.load %arg2[%c0_2, %c0_3] : memref<8x1xi32, #tpu.memory_space<vmem>>, vector<8x1xi32>
    %12 = tpu.iota {dimensions = array<i32: 1>} : vector<8x32xi32>
    %13 = vector.broadcast %11 : vector<8x1xi32> to vector<8x32xi32>
    %14 = arith.cmpi eq, %12, %13 : vector<8x32xi32>
    %15 = arith.extui %14 : vector<8x32xi1> to vector<8x32xi32>
    %16 = arith.sitofp %15 : vector<8x32xi32> to vector<8x32xf32>
    %cst_4 = arith.constant 0.996874988 : f32
    %17 = vector.broadcast %cst_4 : f32 to vector<8x32xf32>
    %18 = arith.mulf %16, %17 : vector<8x32xf32>
    %cst_5 = arith.constant 3.125000e-03 : f32
    %19 = vector.broadcast %cst_5 : f32 to vector<8x32xf32>
    %20 = arith.addf %18, %19 : vector<8x32xf32>
    %cst_6 = arith.constant 0.000000e+00 : f32
    %21 = vector.broadcast %cst_6 : f32 to vector<8x32xf32>
    %22 = arith.subf %21, %20 : vector<8x32xf32>
    %23 = arith.mulf %22, %10 : vector<8x32xf32>
    %cst_7 = arith.constant dense<0.000000e+00> : vector<8xf32>
    %24 = vector.multi_reduction <add>, %23, %cst_7 [1] : vector<8x32xf32> to vector<8xf32>
    %25 = vector.shape_cast %24 : vector<8xf32> to vector<8x1xf32>
    %c8_i32 = arith.constant 8 : i32
    %26 = arith.muli %arg0, %c8_i32 : i32
    %27 = tpu.iota {dimensions = array<i32: 0>} : vector<8x1xi32>
    %28 = vector.broadcast %26 : i32 to vector<8x1xi32>
    %29 = arith.addi %28, %27 : vector<8x1xi32>
    %c8_i32_8 = arith.constant 8 : i32
    %30 = vector.broadcast %c8_i32_8 : i32 to vector<8x1xi32>
    %31 = arith.cmpi slt, %29, %30 : vector<8x1xi32>
    %cst_9 = arith.constant 0.000000e+00 : f32
    %32 = vector.broadcast %cst_9 : f32 to vector<8x1xf32>
    %33 = arith.select %31, %25, %32 : vector<8x1xi1>, vector<8x1xf32>
    %34 = vector.shape_cast %33 : vector<8x1xf32> to vector<1x8x1xf32>
    %cst_10 = arith.constant dense<0.000000e+00> : vector<1xf32>
    %35 = vector.multi_reduction <add>, %34, %cst_10 [1, 2] : vector<1x8x1xf32> to vector<1xf32>
    %36 = vector.shape_cast %35 : vector<1xf32> to vector<1x1x1xf32>
    %37 = vector.extract %36[0, 0, 0] : f32 from vector<1x1x1xf32>
    %c0_11 = arith.constant 0 : index
    %c0_12 = arith.constant 0 : index
    %38 = memref.load %arg3[%c0_11, %c0_12] : memref<1x1xf32, #tpu.memory_space<smem>>
    memref.store %37, %arg3[%c0_11, %c0_12] : memref<1x1xf32, #tpu.memory_space<smem>>
    return
  }
  func.func @transform_0(%arg0: i32) -> (i32, i32) {
    %c0_i32 = arith.constant 0 : i32
    %c0_i32_0 = arith.constant 0 : i32
    return %arg0, %c0_i32 : i32, i32
  }
  func.func @transform_1(%arg0: i32) -> (i32, i32) {
    %c0_i32 = arith.constant 0 : i32
    %c0_i32_0 = arith.constant 0 : i32
    return %arg0, %c0_i32 : i32, i32
  }
  func.func @transform_2(%arg0: i32) -> (i32, i32) {
    %c0_i32 = arith.constant 0 : i32
    %c0_i32_0 = arith.constant 0 : i32
    return %arg0, %c0_i32 : i32, i32
  }
}

</mosaic_0001>

<bundles_post_ra>
// kernel: tpu_custom_call.1
= control target key start
LH: loop header
LB: loop body
LE: loop exit
PB: predicated region body
PF: predicated region fallthrough
CT: control target
= control target key end

     0   :  { %vm13_vm0 = vcmask 261120   ;;  %s127_s0 = inlined_call_operand.vmem [shape: f32[8,32], index: 0, kind: input, shape index: {}]   ;;  %s128_s1 = inlined_call_operand.vmem [shape: s32[8,1], index: 1, kind: input, shape index: {}]   ;;  %s129_s2 = inlined_call_operand.hbm [shape: f32[1,1], index: 2, kind: output, shape index: {}]  }
   0x1   :  { %v12_v0 = vld [vmem:[%s127_s0] sm:$0xff] }
   0x2   :  { %7 = vsyncpa [#allocation3], 0  ;;  %v14_v1 = vsel %vm13_vm0, %v12_v0, -inf  ;;  %v26_v2 = vld [vmem:[%s128_s1] sm:$0xff]  ;;  %v97_v3 = vmov 0   ;;  %v27_v9 = vlaneseq  ;;  %v98_v13 = vmov 0.0  }
   0x3   :  { %15 = vmax.xlane.f32.xlu0 %v14_v1  ;;  %81 = vset.pattern.permute.xlu1 %v97_v3  ;;  %vm49_vm2 = vcmask 7168   ;;  %s99_s1 = smov [#allocation2]  }
   0x4   :  { %82 = vset.pattern.permute.xlu0 %v97_v3  ;;  %30 = vperm.xlu1 %81, %v26_v2   ;;  %v28_v10 = vand.u32 127, %v27_v9 }
  0x7f   :  { %v31_v11 = vpop.permute.xlu1 %30 }
  0x80   :  { %vm32_vm1 = vcmp.eq.s32.totalorder %v28_v10, %v31_v11 }
  0x81   :  { %v75_v14 = vsel %vm32_vm1, 1.0, %v98_v13 }
  0x82   :  { %v35_v15 = vmul.f32 0.996875, %v75_v14 }
  0x84   :  { %v36_v16 = vadd.f32 0.003125, %v35_v15 }
  0x86   :  { %v37_v19 = vsub.f32 0.0, %v36_v16 }
  0x8c   :  { %v16_v4 = vpop.xlane.xlu0 %15 }
  0x8d   :  { %v17_v5 = vsub.f32 %v12_v0, %v16_v4 }
  0x8f   :  { %v18_v6 = vmul.f32 1.442695, %v17_v5 }
  0x91   :  { %83 = vpow2.f32 %v18_v6 }
  0x9e   :  { %v84_v7 = vpop.eup %83 }
  0x9f   :  { %v20_v8 = vsel %vm13_vm0, %v84_v7, 0.0 }
  0xa0   :  { %21 = vadd.xlane.f32.xlu0 %v20_v8 }
 0x129   :  { %v22_v12 = vpop.xlane.xlu0 %21 }
 0x12a   :  { %85 = vlog2.f32 %v22_v12 }
 0x137   :  { %v86_v17 = vpop.eup %85 }
 0x138   :  { %v24_v18 = vmul.f32 0.6931472, %v86_v17 }
 0x13a   :  { %v25_v20 = vsub.f32 %v17_v5, %v24_v18 }
 0x13c   :  { %v38_v21 = vmul.f32 %v37_v19, %v25_v20 }
 0x13e   :  { %v39_v22 = vsel %vm13_vm0, %v38_v21, 0.0 }
 0x13f   :  { %40 = vadd.xlane.f32.xlu1 %v39_v22 }
 0x1c8   :  { %v41_v23 = vpop.xlane.xlu1 %40 }
 0x1c9   :  { %v50_v24 = vsel %vm49_vm2, %v41_v23, 0.0 }
 0x1ca   :  { %51 = vadd.xlane.f32.xlu0 %v50_v24 }
 0x253   :  { %v52_v25 = vpop.xlane.xlu0 %51 }
 0x254   :  { %v53_v26 = vrot.slane %v52_v25, 4 }
 0x256   :  { %v54_v27 = vadd.f32 %v53_v26, %v52_v25 }
 0x258   :  { %v55_v28 = vrot.slane %v54_v27, 2 }
 0x25a   :  { %v56_v29 = vadd.f32 %v55_v28, %v54_v27 }
 0x25c   :  { %v57_v30 = vrot.slane %v56_v29, 1 }
 0x25e   :  { %v58_v31 = vadd.f32 %v57_v30, %v56_v29 }
 0x260   :  { %76 = vpush %v58_v31 }
 0x291   :  { %s77_s0 = spop %76 }
 0x292   :  { %61 = sst [smem:[#allocation2]] %s77_s0 }
 0x293   :  { %69 = dma.smem_to_hbm %s99_s1, 16, %s129_s2, [#allocation3]  }
 0x294   :  { %95 = dma.done.wait [#allocation3], 16  }
 0x295   :  { %96 = vsyncadd [#allocation3], 4294967280 }
 0x296   :  { %73 = sfence }
 0x297   :  { %74 = vsyncpa [#allocation3], 1 }

</bundles_post_ra>
